<compile_context>
chip_gen: v7x
topology: tpu7x:2x2x1
jax: 0.10.0
libtpu: 0.0.40
codegen_flags: <defaults>
</compile_context>

<pallas_src>
import functools
import math

import jax
import jax.numpy as jnp
from jax.experimental import pallas as pl
from jax.experimental.pallas import tpu as pltpu


def _round_up(n, m):
    return ((n + m - 1) // m) * m


def _cdiv(a, b):
    return (a + b - 1) // b


def a2c_fused_kernel(x_ref,
                     w1_ref, b1_ref,
                     w2_ref, b2_ref,
                     wh_ref, bh_ref,
                     out_ref, *, nr_actions):
    """One batch tile of the full A2CNet forward.

    wh/bh are the three heads (loc | scale | value) concatenated along the
    output dim and zero-padded to 128 lanes: one head matmul, one lane-dense
    unmasked store.  Per-lane activations (single tanh EUP pass):
      lanes [0, A)   -> tanh(z)                    (action_head_loc)
      lanes [A, 2A)  -> 0.5*(1 + tanh(z/2))        (== sigmoid, action_head_scale)
      lanes [2A, ..) -> identity                   (value_head + zero padding)
    """
    cdt = w1_ref.dtype   # MXU input dtype for the fc layers (f32 or bf16).
    hdt = wh_ref.dtype   # MXU input dtype for the fused head (f32 by default).

    x = x_ref[...].astype(cdt)
    h = jnp.dot(x, w1_ref[...], preferred_element_type=jnp.float32) + b1_ref[...]
    h = jnp.maximum(h, 0.0)
    h = jnp.dot(h.astype(cdt), w2_ref[...],
                preferred_element_type=jnp.float32) + b2_ref[...]
    h = jnp.maximum(h, 0.0)

    z = jnp.dot(h.astype(hdt), wh_ref[...],
                preferred_element_type=jnp.float32) + bh_ref[...]

    lane = jax.lax.broadcasted_iota(jnp.int32, z.shape, dimension=1)
    is_loc = lane < nr_actions
    is_scale = jnp.logical_and(lane >= nr_actions, lane < 2 * nr_actions)
    # One transcendental sweep: pre-scale sigmoid lanes by 0.5, tanh everything,
    # then fix sigmoid lanes up with 0.5*(t+1).  Exact: sigmoid(z)=0.5*(1+tanh(z/2)).
    t = jnp.tanh(jnp.where(is_scale, 0.5 * z, z))
    out = jnp.where(is_loc, t, jnp.where(is_scale, 0.5 * (t + 1.0), z))
    out_ref[...] = out.astype(out_ref.dtype)


def pack_params(params, *, compute_dtype=jnp.float32, head_dtype=jnp.float32):
    """One-time packing (hoisted out of the forward).

    - hidden dim zero-padded to a multiple of 128 lanes,
    - loc|scale|value head weights concatenated and padded to 128 output lanes,
    - fc weights cast to `compute_dtype` (use jnp.bfloat16 for the v5e/v6e/v7x
      MXU fast path), fused head weights kept in `head_dtype` (f32 by default
      to protect critic precision); biases stay f32.
    Zero-padding keeps the math exact (padded hidden units are relu(0)=0 and hit
    zero weight rows downstream).
    """
    f32 = jnp.float32
    F, H = params["w1"].shape
    A = params["wl"].shape[1]
    Hp = _round_up(H, 128)
    OP = _round_up(2 * A + 1, 128)

    def pad2(a, rows, cols):
        return jnp.pad(a, ((0, rows - a.shape[0]), (0, cols - a.shape[1])))

    wh = jnp.concatenate([params["wl"], params["ws"], params["wv"]], axis=1)
    bh = jnp.concatenate([params["bl"], params["bs"], params["bv"]], axis=1)

    return dict(
        w1=pad2(params["w1"].astype(f32), F, Hp).astype(compute_dtype),
        b1=pad2(params["b1"].astype(f32), 1, Hp),
        w2=pad2(params["w2"].astype(f32), Hp, Hp).astype(compute_dtype),
        b2=pad2(params["b2"].astype(f32), 1, Hp),
        wh=pad2(wh.astype(f32), Hp, OP).astype(head_dtype),
        bh=pad2(bh.astype(f32), 1, OP),
    )


def a2c_net_forward(x, packed, *, nr_actions, block_rows=2048,
                    out_dtype=jnp.float32, min_grid_steps=1):
    """x: (B, F) float32.  packed: output of pack_params (pre-padded weights)."""
    B, F = x.shape
    Hp = packed["w1"].shape[1]
    OP = packed["wh"].shape[1]
    A = nr_actions

    # Balanced batch tiling: TB multiple of 8, sized to minimize tail padding.
    block_rows = max(8, (block_rows // 8) * 8)
    n_tiles = max(_cdiv(B, block_rows), min_grid_steps, 1)
    TB = _round_up(_cdiv(B, n_tiles), 8)
    grid = _cdiv(B, TB)
    pB = grid * TB
    xp = x if pB == B else jnp.pad(x, ((0, pB - B), (0, 0)))

    resident = lambda i: (0, 0)   # weights/biases stay VMEM-resident across the grid

    # vmem_limit from the actual footprint (+slack) instead of a flat 32 MiB.
    isz = lambda d: jnp.dtype(d).itemsize
    w_bytes = sum(int(v.size) * isz(v.dtype) for v in packed.values())
    io_bytes = 2 * TB * F * 4 + 2 * TB * OP * isz(out_dtype)   # double-buffered x / out
    tmp_bytes = 4 * TB * max(Hp, OP) * 4                       # in-kernel intermediates
    vmem_limit = int(min(64 * 1024 * 1024,
                         max(8 * 1024 * 1024,
                             2 * w_bytes + io_bytes + tmp_bytes + 2 * 1024 * 1024)))

    out = pl.pallas_call(
        functools.partial(a2c_fused_kernel, nr_actions=A),
        out_shape=jax.ShapeDtypeStruct((pB, OP), out_dtype),
        grid_spec=pltpu.PrefetchScalarGridSpec(
            num_scalar_prefetch=0,
            grid=(grid,),
            in_specs=[
                pl.BlockSpec((TB, F), lambda i: (i, 0)),   # x batch tile
                pl.BlockSpec((F, Hp), resident),           # w1 (padded)
                pl.BlockSpec((1, Hp), resident),           # b1
                pl.BlockSpec((Hp, Hp), resident),          # w2 (padded)
                pl.BlockSpec((1, Hp), resident),           # b2
                pl.BlockSpec((Hp, OP), resident),          # fused head weight
                pl.BlockSpec((1, OP), resident),           # fused head bias
            ],
            out_specs=pl.BlockSpec((TB, OP), lambda i: (i, 0)),
        ),
        compiler_params=pltpu.CompilerParams(
            dimension_semantics=("parallel",),
            vmem_limit_bytes=vmem_limit,
        ),
    )(xp, packed["w1"], packed["b1"], packed["w2"], packed["b2"],
      packed["wh"], packed["bh"])

    # Single read of the padded slab, then cheap splits.
    head = out[:B, :2 * A + 1].astype(jnp.float32)
    loc = head[:, :A]
    scale = head[:, A:2 * A]
    value = head[:, 2 * A:2 * A + 1]
    return (loc, scale), value


# ----------------------------- test harness ---------------------------------

def init_linear(key, fan_in, fan_out):
    """PyTorch nn.Linear default init (U[-1/sqrt(in), 1/sqrt(in)]), (in, out) layout."""
    kw, kb = jax.random.split(key)
    bound = 1.0 / math.sqrt(fan_in)
    w = jax.random.uniform(kw, (fan_in, fan_out), jnp.float32, -bound, bound)
    b = jax.random.uniform(kb, (1, fan_out), jnp.float32, -bound, bound)
    return w, b


def make_params(key, nr_input_features, nr_actions, nr_hidden_units):
    keys = jax.random.split(key, 5)
    w1, b1 = init_linear(keys[0], nr_input_features, nr_hidden_units)
    w2, b2 = init_linear(keys[1], nr_hidden_units, nr_hidden_units)
    wl, bl = init_linear(keys[2], nr_hidden_units, nr_actions)
    ws, bs = init_linear(keys[3], nr_hidden_units, nr_actions)
    wv, bv = init_linear(keys[4], nr_hidden_units, 1)
    return dict(w1=w1, b1=b1, w2=w2, b2=b2,
                wl=wl, bl=bl, ws=ws, bs=bs, wv=wv, bv=bv)


def reference_forward(x, p):
    h = jnp.maximum(x @ p["w1"] + p["b1"], 0.0)
    h = jnp.maximum(h @ p["w2"] + p["b2"], 0.0)
    loc = jnp.tanh(h @ p["wl"] + p["bl"])
    scale = jax.nn.sigmoid(h @ p["ws"] + p["bs"])
    value = h @ p["wv"] + p["bv"]
    return (loc, scale), value


if __name__ == "__main__":
    batch = 8
    nr_input_features = 16
    nr_actions = 4
    nr_hidden_units = 32

    root = jax.random.PRNGKey(0)
    k_x, k_p, k_big = jax.random.split(root, 3)

    x = jax.random.normal(k_x, (batch, nr_input_features), jnp.float32)
    params = make_params(k_p, nr_input_features, nr_actions, nr_hidden_units)

    # Pack once (pad/concat/cast hoisted out of the hot path).
    packed_f32 = pack_params(params)
    fwd = jax.jit(a2c_net_forward,
                  static_argnames=("nr_actions", "block_rows", "out_dtype",
                                   "min_grid_steps"))

    # --- f32 path, single grid step ---
    (loc, scale), value = fwd(x, packed_f32, nr_actions=nr_actions)
    jax.block_until_ready((loc, scale, value))
    (loc_r, scale_r), value_r = reference_forward(x, params)
    assert loc.shape == (batch, nr_actions)
    assert scale.shape == (batch, nr_actions)
    assert value.shape == (batch, 1)
    assert jnp.allclose(loc, loc_r, atol=1e-5)
    assert jnp.allclose(scale, scale_r, atol=1e-5)
    assert jnp.allclose(value, value_r, atol=1e-5)

    # --- f32 path, balanced batch tiling (B=600 -> 2 tiles of 304 rows) ---
    big_b = 600
    x_big = jax.random.normal(k_big, (big_b, nr_input_features), jnp.float32)
    (loc_b, scale_b), value_b = fwd(x_big, packed_f32, nr_actions=nr_actions,
                                    block_rows=512)
    jax.block_until_ready((loc_b, scale_b, value_b))
    (loc_br, scale_br), value_br = reference_forward(x_big, params)
    assert loc_b.shape == (big_b, nr_actions)
    assert jnp.allclose(loc_b, loc_br, atol=1e-5)
    assert jnp.allclose(scale_b, scale_br, atol=1e-5)
    assert jnp.allclose(value_b, value_br, atol=1e-4)

    # --- bf16 MXU-input fast path (fc layers bf16, fused head kept f32) ---
    packed_bf16 = pack_params(params, compute_dtype=jnp.bfloat16)
    (loc_h, scale_h), value_h = fwd(x, packed_bf16, nr_actions=nr_actions)
    jax.block_until_ready((loc_h, scale_h, value_h))
    assert jnp.allclose(loc_h, loc_r, atol=1e-1)
    assert jnp.allclose(scale_h, scale_r, atol=1e-1)
    assert jnp.allclose(value_h, value_r, atol=1e-1)

    print("KERNEL_OK")
</pallas_src>

<mosaic_0001>
module attributes {stable_mosaic.version = 11 : i64} {
  func.func @a2c_fused_kernel(%arg0: i32, %arg1: memref<8x16xf32, #tpu.memory_space<vmem>>, %arg2: memref<16x128xf32, #tpu.memory_space<vmem>>, %arg3: memref<1x128xf32, #tpu.memory_space<vmem>>, %arg4: memref<128x128xf32, #tpu.memory_space<vmem>>, %arg5: memref<1x128xf32, #tpu.memory_space<vmem>>, %arg6: memref<128x128xf32, #tpu.memory_space<vmem>>, %arg7: memref<1x128xf32, #tpu.memory_space<vmem>>, %arg8: memref<8x128xf32, #tpu.memory_space<vmem>>) attributes {dimension_semantics = [#tpu.dimension_semantics<parallel>], iteration_bounds = array<i64: 1>, scalar_prefetch = 0 : i64, scratch_operands = 0 : i64, tpu.core_type = #tpu.core_type<tc>, window_params = [{transform_indices = @transform_0, window_bounds = array<i64: 8, 16>}, {pipeline_mode = #tpu.pipeline_mode<synchronous>, transform_indices = @transform_1, window_bounds = array<i64: 16, 128>}, {pipeline_mode = #tpu.pipeline_mode<synchronous>, transform_indices = @transform_2, window_bounds = array<i64: 1, 128>}, {pipeline_mode = #tpu.pipeline_mode<synchronous>, transform_indices = @transform_3, window_bounds = array<i64: 128, 128>}, {pipeline_mode = #tpu.pipeline_mode<synchronous>, transform_indices = @transform_4, window_bounds = array<i64: 1, 128>}, {pipeline_mode = #tpu.pipeline_mode<synchronous>, transform_indices = @transform_5, window_bounds = array<i64: 128, 128>}, {pipeline_mode = #tpu.pipeline_mode<synchronous>, transform_indices = @transform_6, window_bounds = array<i64: 1, 128>}, {transform_indices = @transform_7, window_bounds = array<i64: 8, 128>}]} {
    %c0 = arith.constant 0 : index
    %c0_0 = arith.constant 0 : index
    %0 = vector.load %arg1[%c0, %c0_0] : memref<8x16xf32, #tpu.memory_space<vmem>>, vector<8x16xf32>
    %c0_1 = arith.constant 0 : index
    %c0_2 = arith.constant 0 : index
    %1 = vector.load %arg2[%c0_1, %c0_2] : memref<16x128xf32, #tpu.memory_space<vmem>>, vector<16x128xf32>
    %cst = arith.constant dense<0.000000e+00> : vector<8x128xf32>
    %2 = tpu.matmul %0, %1, %cst {dimension_numbers = #tpu.dot_dimension_numbers<[1], [0], [0], [1], [0, 0, 1, 1], [], []>} : vector<8x16xf32>, vector<16x128xf32>, vector<8x128xf32> -> vector<8x128xf32>
    %c0_3 = arith.constant 0 : index
    %c0_4 = arith.constant 0 : index
    %3 = vector.load %arg3[%c0_3, %c0_4] : memref<1x128xf32, #tpu.memory_space<vmem>>, vector<1x128xf32>
    %4 = vector.broadcast %3 : vector<1x128xf32> to vector<8x128xf32>
    %5 = arith.addf %2, %4 : vector<8x128xf32>
    %cst_5 = arith.constant 0.000000e+00 : f32
    %6 = vector.broadcast %cst_5 : f32 to vector<8x128xf32>
    %7 = arith.maximumf %5, %6 : vector<8x128xf32>
    %c0_6 = arith.constant 0 : index
    %c0_7 = arith.constant 0 : index
    %8 = vector.load %arg4[%c0_6, %c0_7] : memref<128x128xf32, #tpu.memory_space<vmem>>, vector<128x128xf32>
    %cst_8 = arith.constant dense<0.000000e+00> : vector<8x128xf32>
    %9 = tpu.matmul %7, %8, %cst_8 {dimension_numbers = #tpu.dot_dimension_numbers<[1], [0], [0], [1], [0, 0, 1, 1], [], []>} : vector<8x128xf32>, vector<128x128xf32>, vector<8x128xf32> -> vector<8x128xf32>
    %c0_9 = arith.constant 0 : index
    %c0_10 = arith.constant 0 : index
    %10 = vector.load %arg5[%c0_9, %c0_10] : memref<1x128xf32, #tpu.memory_space<vmem>>, vector<1x128xf32>
    %11 = vector.broadcast %10 : vector<1x128xf32> to vector<8x128xf32>
    %12 = arith.addf %9, %11 : vector<8x128xf32>
    %cst_11 = arith.constant 0.000000e+00 : f32
    %13 = vector.broadcast %cst_11 : f32 to vector<8x128xf32>
    %14 = arith.maximumf %12, %13 : vector<8x128xf32>
    %c0_12 = arith.constant 0 : index
    %c0_13 = arith.constant 0 : index
    %15 = vector.load %arg6[%c0_12, %c0_13] : memref<128x128xf32, #tpu.memory_space<vmem>>, vector<128x128xf32>
    %cst_14 = arith.constant dense<0.000000e+00> : vector<8x128xf32>
    %16 = tpu.matmul %14, %15, %cst_14 {dimension_numbers = #tpu.dot_dimension_numbers<[1], [0], [0], [1], [0, 0, 1, 1], [], []>} : vector<8x128xf32>, vector<128x128xf32>, vector<8x128xf32> -> vector<8x128xf32>
    %c0_15 = arith.constant 0 : index
    %c0_16 = arith.constant 0 : index
    %17 = vector.load %arg7[%c0_15, %c0_16] : memref<1x128xf32, #tpu.memory_space<vmem>>, vector<1x128xf32>
    %18 = vector.broadcast %17 : vector<1x128xf32> to vector<8x128xf32>
    %19 = arith.addf %16, %18 : vector<8x128xf32>
    %20 = tpu.iota {dimensions = array<i32: 1>} : vector<8x128xi32>
    %c4_i32 = arith.constant 4 : i32
    %21 = vector.broadcast %c4_i32 : i32 to vector<8x128xi32>
    %22 = arith.cmpi slt, %20, %21 : vector<8x128xi32>
    %c4_i32_17 = arith.constant 4 : i32
    %23 = vector.broadcast %c4_i32_17 : i32 to vector<8x128xi32>
    %24 = arith.cmpi sge, %20, %23 : vector<8x128xi32>
    %c8_i32 = arith.constant 8 : i32
    %25 = vector.broadcast %c8_i32 : i32 to vector<8x128xi32>
    %26 = arith.cmpi slt, %20, %25 : vector<8x128xi32>
    %27 = arith.andi %24, %26 : vector<8x128xi1>
    %cst_18 = arith.constant 5.000000e-01 : f32
    %28 = vector.broadcast %cst_18 : f32 to vector<8x128xf32>
    %29 = arith.mulf %28, %19 : vector<8x128xf32>
    %30 = arith.select %27, %29, %19 : vector<8x128xi1>, vector<8x128xf32>
    %31 = math.tanh %30 : vector<8x128xf32>
    %cst_19 = arith.constant 1.000000e+00 : f32
    %32 = vector.broadcast %cst_19 : f32 to vector<8x128xf32>
    %33 = arith.addf %31, %32 : vector<8x128xf32>
    %cst_20 = arith.constant 5.000000e-01 : f32
    %34 = vector.broadcast %cst_20 : f32 to vector<8x128xf32>
    %35 = arith.mulf %34, %33 : vector<8x128xf32>
    %36 = arith.select %27, %35, %19 : vector<8x128xi1>, vector<8x128xf32>
    %37 = arith.select %22, %31, %36 : vector<8x128xi1>, vector<8x128xf32>
    %c0_21 = arith.constant 0 : index
    %c0_22 = arith.constant 0 : index
    %38 = vector.load %arg8[%c0_21, %c0_22] : memref<8x128xf32, #tpu.memory_space<vmem>>, vector<8x128xf32>
    tpu.vector_store %arg8[%c0_21, %c0_22], %37 {strides = array<i32>} : memref<8x128xf32, #tpu.memory_space<vmem>>, vector<8x128xf32>,
    return
  }
  func.func @transform_0(%arg0: i32) -> (i32, i32) {
    %c0_i32 = arith.constant 0 : i32
    %c0_i32_0 = arith.constant 0 : i32
    return %arg0, %c0_i32 : i32, i32
  }
  func.func @transform_1(%arg0: i32) -> (i32, i32) {
    %c0_i32 = arith.constant 0 : i32
    %c0_i32_0 = arith.constant 0 : i32
    %c0_i32_1 = arith.constant 0 : i32
    return %c0_i32, %c0_i32_0 : i32, i32
  }
  func.func @transform_2(%arg0: i32) -> (i32, i32) {
    %c0_i32 = arith.constant 0 : i32
    %c0_i32_0 = arith.constant 0 : i32
    %c0_i32_1 = arith.constant 0 : i32
    return %c0_i32, %c0_i32_0 : i32, i32
  }
  func.func @transform_3(%arg0: i32) -> (i32, i32) {
    %c0_i32 = arith.constant 0 : i32
    %c0_i32_0 = arith.constant 0 : i32
    %c0_i32_1 = arith.constant 0 : i32
    return %c0_i32, %c0_i32_0 : i32, i32
  }
  func.func @transform_4(%arg0: i32) -> (i32, i32) {
    %c0_i32 = arith.constant 0 : i32
    %c0_i32_0 = arith.constant 0 : i32
    %c0_i32_1 = arith.constant 0 : i32
    return %c0_i32, %c0_i32_0 : i32, i32
  }
  func.func @transform_5(%arg0: i32) -> (i32, i32) {
    %c0_i32 = arith.constant 0 : i32
    %c0_i32_0 = arith.constant 0 : i32
    %c0_i32_1 = arith.constant 0 : i32
    return %c0_i32, %c0_i32_0 : i32, i32
  }
  func.func @transform_6(%arg0: i32) -> (i32, i32) {
    %c0_i32 = arith.constant 0 : i32
    %c0_i32_0 = arith.constant 0 : i32
    %c0_i32_1 = arith.constant 0 : i32
    return %c0_i32, %c0_i32_0 : i32, i32
  }
  func.func @transform_7(%arg0: i32) -> (i32, i32) {
    %c0_i32 = arith.constant 0 : i32
    %c0_i32_0 = arith.constant 0 : i32
    return %arg0, %c0_i32 : i32, i32
  }
}

</mosaic_0001>

<bundles_post_ra>
// kernel: a2c_net_forward.1
= control target key start
LH: loop header
LB: loop body
LE: loop exit
PB: predicated region body
PF: predicated region fallthrough
CT: control target
= control target key end

     0   :  { %12 = vsyncpa [#allocation3], 0  ;;  %s784_s0 = inlined_call_operand.hbm [shape: f32[8,16], index: 0, kind: input, shape index: {}]   ;;  %s785_s1 = inlined_call_operand.hbm [shape: f32[16,128], index: 1, kind: input, shape index: {}]   ;;  %s786_s2 = inlined_call_operand.vmem [shape: f32[1,128], index: 2, kind: input, shape index: {}]   ;;  %s787_s3 = inlined_call_operand.hbm [shape: f32[128,128], index: 3, kind: input, shape index: {}]   ;;  %s788_s4 = inlined_call_operand.vmem [shape: f32[1,128], index: 4, kind: input, shape index: {}]   ;;  %s789_s5 = inlined_call_operand.hbm [shape: f32[128,128], index: 5, kind: input, shape index: {}]   ;;  %s790_s6 = inlined_call_operand.vmem [shape: f32[1,128], index: 6, kind: input, shape index: {}]   ;;  %s791_s7 = inlined_call_operand.vmem [shape: f32[8,128], index: 7, kind: output, shape index: {}]  }
   0x1   :  { %13 = vsyncpa [#allocation5], 0 }
   0x2   :  { %14 = vsyncpa [#allocation8], 0  ;;  %s646_s24 = smov [#allocation4]   ;;  %s552_s28 = scalar_lea.hbm %s785_s1, 256 }
   0x3   :  { %s30_s25 = sshll.u32 %s646_s24, 4  ;;  %p553_p0 = scmp.ne.s32.totalorder %s785_s1, %s552_s28  ;;  %s31_s25 = int_to_ptr.vmem [resolvable:$true] %s30_s25 }
   0x4   :  { %p556_p1 = scmp.lt.u32.totalorder %s552_s28, %s785_s1 }
   0x6   :  { %p558_p2 = pnand %p556_p1, %p553_p0 }
   0x8   :  { %561 = shalt.err (!%p558_p2)
}
   0x9   :  { %s562_s10 = scalar_lea.vmem %s31_s25, 256  ;;  %p567_p4 = scmp.lt.s32.totalorder %s31_s25, %s31_s25 }
   0xa   :  { %p563_p3 = scmp.ne.s32.totalorder %s31_s25, %s562_s10  ;;  %p568_p5 = scmp.lt.s32.totalorder %s562_s10, %s562_s10 }
   0xc   :  { %p569_p6 = por %p568_p5, %p567_p4 }
   0xe   :  { %p570_p7 = pnand %p569_p6, %p563_p3 }
  0x10   :  { %573 = shalt.err (!%p570_p7)
}
  0x11   :  { %s647_s11 = smov 128   ;;  %s648_s12 = smov 8  }
  0x12   :  { %36 = dma.hbm_to_vmem [thread:$0]  %s785_s1, 256, %s31_s25, [#allocation5], %s647_s11, %s647_s11, %s648_s12  }
  0x13   :  { %s649_s15 = smov [#allocation2]   ;;  %s650_s17 = smov [#allocation6]  }
  0x14   :  { %s21_s16 = sshll.u32 %s649_s15, 4  ;;  %s44_s18 = sshll.u32 %s650_s17, 4  ;;  %s22_s16 = int_to_ptr.vmem [resolvable:$true] %s21_s16  ;;  %s45_s18 = int_to_ptr.vmem [resolvable:$true] %s44_s18 }
  0x15   :  { %s574_s21 = scalar_lea.hbm %s784_s0, 128 }
  0x16   :  { %p575_p8 = scmp.ne.s32.totalorder %s784_s0, %s574_s21  ;;  %p578_p9 = scmp.lt.u32.totalorder %s574_s21, %s784_s0 }
  0x18   :  { %p580_p10 = pnand %p578_p9, %p575_p8 }
  0x1a   :  { %583 = shalt.err (!%p580_p10)
}
  0x1b   :  { %s584_s1 = scalar_lea.vmem %s22_s16, 128  ;;  %p589_p12 = scmp.lt.s32.totalorder %s22_s16, %s22_s16 }
  0x1c   :  { %p585_p11 = scmp.ne.s32.totalorder %s22_s16, %s584_s1  ;;  %p590_p13 = scmp.lt.s32.totalorder %s584_s1, %s584_s1 }
  0x1e   :  { %p591_p0 = por %p590_p13, %p589_p12 }
  0x20   :  { %p592_p1 = pnand %p591_p0, %p585_p11 }
  0x22   :  { %595 = shalt.err (!%p592_p1)
}
  0x23   :  { %24 = dma.hbm_to_vmem [thread:$0]  %s784_s0, 128, %s22_s16, [#allocation3]  }
  0x24   :  { %s596_s30 = scalar_lea.hbm %s787_s3, 2048 }
  0x25   :  { %p597_p2 = scmp.ne.s32.totalorder %s787_s3, %s596_s30  ;;  %p600_p3 = scmp.lt.u32.totalorder %s596_s30, %s787_s3 }
  0x27   :  { %p602_p4 = pnand %p600_p3, %p597_p2 }
  0x29   :  { %605 = shalt.err (!%p602_p4)
}
  0x2a   :  { %s606_s14 = scalar_lea.vmem %s45_s18, 2048  ;;  %p611_p6 = scmp.lt.s32.totalorder %s45_s18, %s45_s18 }
  0x2b   :  { %p607_p5 = scmp.ne.s32.totalorder %s45_s18, %s606_s14  ;;  %p612_p7 = scmp.lt.s32.totalorder %s606_s14, %s606_s14 }
  0x2d   :  { %p613_p8 = por %p612_p7, %p611_p6 }
  0x2f   :  { %p614_p9 = pnand %p613_p8, %p607_p5 }
  0x31   :  { %617 = shalt.err (!%p614_p9)
}
  0x32   :  { %50 = dma.hbm_to_vmem [thread:$0]  %s787_s3, 2048, %s45_s18, [#allocation5], %s647_s11, %s647_s11, %s648_s12  }
  0x33   :  { %s651_s16 = smov [#allocation7]   ;;  %s618_s21 = scalar_lea.hbm %s789_s5, 2048 }
  0x34   :  { %s58_s17 = sshll.u32 %s651_s16, 4  ;;  %p619_p10 = scmp.ne.s32.totalorder %s789_s5, %s618_s21  ;;  %s59_s17 = int_to_ptr.vmem [resolvable:$true] %s58_s17 }
  0x35   :  { %p622_p11 = scmp.lt.u32.totalorder %s618_s21, %s789_s5 }
  0x37   :  { %p624_p12 = pnand %p622_p11, %p619_p10 }
  0x39   :  { %627 = shalt.err (!%p624_p12)
}
  0x3a   :  { %s628_s1 = scalar_lea.vmem %s59_s17, 2048  ;;  %p633_p0 = scmp.lt.s32.totalorder %s59_s17, %s59_s17 }
  0x3b   :  { %p629_p13 = scmp.ne.s32.totalorder %s59_s17, %s628_s1  ;;  %p634_p1 = scmp.lt.s32.totalorder %s628_s1, %s628_s1 }
  0x3d   :  { %p635_p2 = por %p634_p1, %p633_p0 }
  0x3f   :  { %p636_p3 = pnand %p635_p2, %p629_p13 }
  0x41   :  { %639 = shalt.err (!%p636_p3)
}
  0x42   :  { %64 = dma.hbm_to_vmem [thread:$0]  %s789_s5, 2048, %s59_s17, [#allocation8], %s647_s11, %s647_s11, %s648_s12  }
  0x43   :  { %640 = dma.done.wait [#allocation3], 128  }
  0x44   :  { %641 = vsyncadd [#allocation3], 4294967168 }
  0x45   :  { %642 = dma.done.wait [#allocation5], 2304  }
  0x46   :  { %643 = vsyncadd [#allocation5], 4294964992 }
  0x47   :  { %644 = dma.done.wait [#allocation8], 2048  }
  0x48   :  { %645 = vsyncadd [#allocation8], 4294965248  ;;  %v652_v0 = vmov 0.0|0.0   ;;  %vm653_vm0 = vmmov 0   ;;  %v654_v1 = vmov 0.0   ;;  %v80_v2 = vld [vmem:[#allocation4] sm:$0xff] }
  0x49   :  { %490 = vmatprep.subr.bf16.mxu0 %v652_v0  ;;  %417 = vmatprep.mubr.msk.f32.mxu0 %vm653_vm0, %v654_v1  ;;  %v81_v3 = vld [vmem:[#allocation4 + $0x8] sm:$0xff]  ;;  %v164_v5 = vld [vmem:[#allocation6] sm:$0xff]  ;;  %v165_v6 = vld [vmem:[#allocation6 + $0x8] sm:$0xff]  ;;  %vm89_vm1 = vcmask 130048  }
  0x4a   :  { %493 = vmatprep.subr.bf16.mxu1 %v652_v0  ;;  %452 = vmatprep.mubr.msk.f32.mxu1 %vm653_vm0, %v654_v1  ;;  %v491_v4 = vpack.c.bf16 %v81_v3, %v80_v2  ;;  %v166_v7 = vld [vmem:[#allocation6 + $0x10] sm:$0xff]  ;;  %v494_v8 = vpack.c.bf16 %v165_v6, %v164_v5  ;;  %v167_v9 = vld [vmem:[#allocation6 + $0x18] sm:$0xff]  ;;  %v79_v10 = vld [vmem:[#allocation2] sm:$0xff] }
  0x4b   :  { %v497_v11 = vpack.c.bf16 %v167_v9, %v166_v7  ;;  %v168_v12 = vld [vmem:[#allocation6 + $0x20] sm:$0xff]  ;;  %v169_v13 = vld [vmem:[#allocation6 + $0x28] sm:$0xff]  ;;  %v170_v15 = vld [vmem:[#allocation6 + $0x30] sm:$0xff] }
  0x4c   :  { %492 = vmatpush3.bf16.msra.mxu0 %v491_v4  ;;  %495 = vmatpush3.bf16.msra.mxu1 %v494_v8  ;;  %v500_v14 = vpack.c.bf16 %v169_v13, %v168_v12  ;;  %v171_v16 = vld [vmem:[#allocation6 + $0x38] sm:$0xff]  ;;  %v172_v18 = vld [vmem:[#allocation6 + $0x40] sm:$0xff]  ;;  %v173_v19 = vld [vmem:[#allocation6 + $0x48] sm:$0xff] }
  0x4d   :  { %517 = vmatprep.subr.bf16.mxu0 %v652_v0  ;;  %496 = vmatprep.subr.bf16.mxu1 %v652_v0  ;;  %v503_v17 = vpack.c.bf16 %v171_v16, %v170_v15  ;;  %v506_v20 = vpack.c.bf16 %v173_v19, %v172_v18  ;;  %v174_v21 = vld [vmem:[#allocation6 + $0x50] sm:$0xff]  ;;  %v175_v22 = vld [vmem:[#allocation6 + $0x58] sm:$0xff]  ;;  %v176_v24 = vld [vmem:[#allocation6 + $0x60] sm:$0xff] }
  0x4e   :  { %v509_v23 = vpack.c.bf16 %v175_v22, %v174_v21  ;;  %v177_v25 = vld [vmem:[#allocation6 + $0x68] sm:$0xff]  ;;  %v178_v27 = vld [vmem:[#allocation6 + $0x70] sm:$0xff]  ;;  %v179_v28 = vld [vmem:[#allocation6 + $0x78] sm:$0xff] }
  0x4f   :  { %418 = vmatmul.mubr.msk.f32.vlgmr.msra.gmra.mrb[0].mxu0 %vm89_vm1, %v79_v10  ;;  %v512_v26 = vpack.c.bf16 %v177_v25, %v176_v24  ;;  %v515_v29 = vpack.c.bf16 %v179_v28, %v178_v27  ;;  %v258_v30 = vld [vmem:[#allocation7] sm:$0xff]  ;;  %v259_v31 = vld [vmem:[#allocation7 + $0x8] sm:$0xff]  ;;  %v260_v32 = vld [vmem:[#allocation7 + $0x10] sm:$0xff] }
  0x50   :  { %487 = vmatprep.mubr.msk.f32.mxu0 %vm653_vm0, %v654_v1  ;;  %498 = vmatpush3.bf16.msra.mxu1 %v497_v11  ;;  %v518_v33 = vpack.c.bf16 %v259_v31, %v258_v30  ;;  %v261_v34 = vld [vmem:[#allocation7 + $0x18] sm:$0xff]  ;;  %v262_v36 = vld [vmem:[#allocation7 + $0x20] sm:$0xff]  ;;  %v263_v37 = vld [vmem:[#allocation7 + $0x28] sm:$0xff] }
  0x51   :  { %499 = vmatprep.subr.bf16.mxu1 %v652_v0  ;;  %v521_v35 = vpack.c.bf16 %v261_v34, %v260_v32  ;;  %v524_v38 = vpack.c.bf16 %v263_v37, %v262_v36  ;;  %v264_v39 = vld [vmem:[#allocation7 + $0x30] sm:$0xff]  ;;  %v265_v40 = vld [vmem:[#allocation7 + $0x38] sm:$0xff]  ;;  %v266_v42 = vld [vmem:[#allocation7 + $0x40] sm:$0xff] }
  0x52   :  { %519 = vmatpush3.bf16.msra.mxu0 %v518_v33  ;;  %v527_v41 = vpack.c.bf16 %v265_v40, %v264_v39  ;;  %v267_v43 = vld [vmem:[#allocation7 + $0x48] sm:$0xff]  ;;  %v268_v45 = vld [vmem:[#allocation7 + $0x50] sm:$0xff]  ;;  %v269_v46 = vld [vmem:[#allocation7 + $0x58] sm:$0xff] }
  0x53   :  { %520 = vmatprep.subr.bf16.mxu0 %v652_v0  ;;  %v530_v44 = vpack.c.bf16 %v267_v43, %v266_v42  ;;  %v533_v47 = vpack.c.bf16 %v269_v46, %v268_v45  ;;  %v270_v48 = vld [vmem:[#allocation7 + $0x60] sm:$0xff]  ;;  %v271_v49 = vld [vmem:[#allocation7 + $0x68] sm:$0xff]  ;;  %v272_v56 = vld [vmem:[#allocation7 + $0x70] sm:$0xff] }
  0x54   :  { %501 = vmatpush3.bf16.msra.mxu1 %v500_v14  ;;  %v536_v50 = vpack.c.bf16 %v271_v49, %v270_v48  ;;  %v372_v51 = vld [vmem:[%s786_s2] ss:$0 sm:$0xff]  ;;  %v273_v57 = vld [vmem:[#allocation7 + $0x78] sm:$0xff] }
  0x55   :  { %502 = vmatprep.subr.bf16.mxu1 %v652_v0  ;;  %v539_v58 = vpack.c.bf16 %v273_v57, %v272_v56  ;;  %v374_v59 = vld [vmem:[%s788_s4] ss:$0 sm:$0xff] }
  0x56   :  { %522 = vmatpush3.bf16.msra.mxu0 %v521_v35  ;;  %v375_v2 = vld [vmem:[%s790_s6] ss:$0 sm:$0xff] }
  0x57   :  { %523 = vmatprep.subr.bf16.mxu0 %v652_v0 }
  0x58   :  { %504 = vmatpush3.bf16.msra.mxu1 %v503_v17 }
  0x59   :  { %505 = vmatprep.subr.bf16.mxu1 %v652_v0 }
  0x5a   :  { %525 = vmatpush3.bf16.msra.mxu0 %v524_v38 }
  0x5b   :  { %526 = vmatprep.subr.bf16.mxu0 %v652_v0 }
  0x5c   :  { %507 = vmatpush3.bf16.msra.mxu1 %v506_v20 }
  0x5d   :  { %508 = vmatprep.subr.bf16.mxu1 %v652_v0 }
  0x5e   :  { %528 = vmatpush3.bf16.msra.mxu0 %v527_v41 }
  0x5f   :  { %529 = vmatprep.subr.bf16.mxu0 %v652_v0 }
  0x60   :  { %510 = vmatpush3.bf16.msra.mxu1 %v509_v23 }
  0x61   :  { %511 = vmatprep.subr.bf16.mxu1 %v652_v0 }
  0x62   :  { %531 = vmatpush3.bf16.msra.mxu0 %v530_v44 }
  0x63   :  { %532 = vmatprep.subr.bf16.mxu0 %v652_v0 }
  0x64   :  { %513 = vmatpush3.bf16.msra.mxu1 %v512_v26 }
  0x65   :  { %514 = vmatprep.subr.bf16.mxu1 %v652_v0 }
  0x66   :  { %534 = vmatpush3.bf16.msra.mxu0 %v533_v47 }
  0x67   :  { %535 = vmatprep.subr.bf16.mxu0 %v652_v0 }
  0x68   :  { %516 = vmatpush3.bf16.msra.mxu1 %v515_v29 }
  0x6a   :  { %537 = vmatpush3.bf16.msra.mxu0 %v536_v50 }
  0x6b   :  { %538 = vmatprep.subr.bf16.mxu0 %v652_v0  ;;  %v351_v0 = vlaneseq }
  0x6d   :  { %v352_v1 = vand.u32 127, %v351_v0 }
  0x6e   :  { %540 = vmatpush3.bf16.msra.mxu0 %v539_v58 }
  0x6f   :  { %vm354_vm2 = vcmp.ge.s32.totalorder %v352_v1, 4  ;;  %vm355_vm3 = vcmp.lt.s32.totalorder %v352_v1, 8  ;;  %vm353_vm5 = vcmp.lt.s32.totalorder %v352_v1, 4 }
  0x70   :  { %vm356_vm4 = vmand %vm354_vm2, %vm355_vm3 }
 0x122   :  { %v159_v52 = vpop.f32.mrb[0].mxu0 }
 0x123   :  { %v160_v53 = vadd.f32 %v372_v51, %v159_v52  ;;  %v419_v54 = vpop.f32.mrb[1].mxu0 }
 0x125   :  { %v163_v55 = vmax.f32 %v160_v53, 0.0 }
 0x127   :  { %453 = vmatmul.mubr.f32.vlgmr.msra.gmra.mrb[0].mxu1 %v163_v55 }
 0x1fa   :  { %v253_v60 = vpop.f32.mrb[0].mxu1 }
 0x1fb   :  { %v254_v61 = vadd.f32 %v374_v59, %v253_v60  ;;  %v454_v62 = vpop.f32.mrb[1].mxu1 }
 0x1fd   :  { %v257_v63 = vmax.f32 %v254_v61, 0.0 }
 0x1ff   :  { %488 = vmatmul.mubr.f32.vlgmr.msra.gmra.mrb[2].mxu0 %v257_v63 }
 0x2d2   :  { %v347_v3 = vpop.f32.mrb[2].mxu0 }
 0x2d3   :  { %v348_v4 = vadd.f32 %v375_v2, %v347_v3  ;;  %v489_v5 = vpop.f32.mrb[3].mxu0 }
 0x2d5   :  { %v357_v6 = vmul.f32 0.5, %v348_v4 }
 0x2d7   :  { %v358_v7 = vsel %vm356_vm4, %v357_v6, %v348_v4 }
 0x2d8   :  { %550 = vtanh.f32 %v358_v7 }
 0x2e2   :  { %v551_v8 = vpop.eup %550 }
 0x2e3   :  { %v360_v9 = vadd.f32 1.0, %v551_v8 }
 0x2e5   :  { %v361_v10 = vmul.f32 0.5, %v360_v9 }
 0x2e7   :  { %v362_v11 = vsel %vm356_vm4, %v361_v10, %v348_v4 }
 0x2e8   :  { %v363_v12 = vsel %vm353_vm5, %v551_v8, %v362_v11 }
 0x2e9   :  { %364 = vst [vmem:[%s791_s7] sm:$0xff] %v363_v12 }
 0x2ea   :  { %369 = vsyncpa [#allocation3], 1 }
 0x2eb   :  { %370 = vsyncpa [#allocation5], 1 }
 0x2ec   :  { %371 = vsyncpa [#allocation8], 1 }

</bundles_post_ra>
